<compile_context>
chip_gen: v5e
topology: v5e:2x2
jax: 0.10.0
libtpu: 0.0.40
codegen_flags: <defaults>
</compile_context>

<pallas_src>
import jax
import jax.numpy as jnp
from jax.experimental import pallas as pl
from jax.experimental.pallas import tpu as pltpu

NEG_SLOPE = 0.01  # F.leaky_relu default
H1, H2 = 64, 32


def _round_up(x, m):
    return ((x + m - 1) // m) * m


def _leaky_relu(x, slope=NEG_SLOPE):
    return jnp.where(x > 0, x, slope * x)


def critic_kernel(x_ref, w1_ref, b1_ref, w2_ref, b2_ref, wv_ref, bv_ref, out_ref):
    # x_ref:  [TB, S]  bf16           (batch rows, natural layout)
    # w1_ref: [S, 64]  bf16   b1_ref: [1, 64]  f32
    # w2_ref: [64, 32] bf16   b2_ref: [1, 32]  f32
    # wv_ref: [32, 1]  bf16   bv_ref: [1]      f32  (SMEM scalar)
    # out_ref:[TB, 1]  f32
    x = x_ref[...]                                                     # bf16

    h1 = jnp.dot(x, w1_ref[...],
                 preferred_element_type=jnp.float32) + b1_ref[...]     # [TB, 64] f32
    h1 = _leaky_relu(h1)

    h2 = jnp.dot(h1.astype(jnp.bfloat16), w2_ref[...],
                 preferred_element_type=jnp.float32) + b2_ref[...]     # [TB, 32] f32
    h2 = _leaky_relu(h2)

    v = jnp.dot(h2.astype(jnp.bfloat16), wv_ref[...],
                preferred_element_type=jnp.float32) + bv_ref[0]        # [TB, 1] f32
    out_ref[...] = v.astype(out_ref.dtype)


def _pick_batch_tiling(B, batch_tile):
    """Balanced batch tiles; >=2 tiles for v7x megacore when B is big enough."""
    n_tiles = pl.cdiv(B, batch_tile)
    if n_tiles == 1 and B >= 2048:
        n_tiles = 2  # give the "parallel" axis something to shard across 2 TCs
    if n_tiles == 1:
        return B, 1  # single full-batch block (full-dim block is always legal)
    TB = _round_up(pl.cdiv(B, n_tiles), 16)  # 16 = bf16 sublane tile
    return TB, pl.cdiv(B, TB)


def critic_forward(x, params, *, batch_tile=4096):
    """x: [B, state_dim] (f32 or bf16)  ->  value: [B, 1] f32.

    params are PyTorch nn.Linear-style: w [out, in], b [out].
    """
    w1, b1, w2, b2, wv, bv = params
    B, S = x.shape

    # Cheap one-time prep (fuses with the producer under jit): bf16 x stream,
    # weights transposed to [in, out] + bf16, biases to [1, out] rows / SMEM scalar.
    x_bf = x if x.dtype == jnp.bfloat16 else x.astype(jnp.bfloat16)
    w1t = w1.T.astype(jnp.bfloat16)                 # [S, 64]
    w2t = w2.T.astype(jnp.bfloat16)                 # [64, 32]
    wvt = wv.T.astype(jnp.bfloat16)                 # [32, 1]
    b1r = b1.reshape(1, H1).astype(jnp.float32)     # [1, 64]
    b2r = b2.reshape(1, H2).astype(jnp.float32)     # [1, 32]
    bvs = bv.reshape(1).astype(jnp.float32)         # [1]  -> SMEM

    TB, n_tiles = _pick_batch_tiling(B, batch_tile)

    out = pl.pallas_call(
        critic_kernel,
        out_shape=jax.ShapeDtypeStruct((B, 1), jnp.float32),
        grid=(n_tiles,),
        in_specs=[
            # streamed x tile (double-buffered by the Pallas pipeline)
            pl.BlockSpec((TB, S), lambda i: (i, 0)),
            # weights / biases: constant block index -> DMA'd once, VMEM-resident
            pl.BlockSpec((S, H1), lambda i: (0, 0)),
            pl.BlockSpec((1, H1), lambda i: (0, 0)),
            pl.BlockSpec((H1, H2), lambda i: (0, 0)),
            pl.BlockSpec((1, H2), lambda i: (0, 0)),
            pl.BlockSpec((H2, 1), lambda i: (0, 0)),
            # value-head bias as an SMEM scalar
            pl.BlockSpec(memory_space=pltpu.MemorySpace.SMEM),
        ],
        out_specs=pl.BlockSpec((TB, 1), lambda i: (i, 0)),
        compiler_params=pltpu.CompilerParams(
            dimension_semantics=("parallel",),        # batch tiles across TCs on v7x
            vmem_limit_bytes=32 * 1024 * 1024,        # headroom for large TB on v5e
        ),
    )(x_bf, w1t, b1r, w2t, b2r, wvt, bvs)

    return out  # [B, 1] f32


def init_critic_params(key, state_dim):
    """PyTorch nn.Linear-style init: w [out, in], b [out]."""
    def linear(k, fan_in, fan_out):
        kw, kb = jax.random.split(k)
        bound = 1.0 / (fan_in ** 0.5)
        w = jax.random.uniform(kw, (fan_out, fan_in), jnp.float32, -bound, bound)
        b = jax.random.uniform(kb, (fan_out,), jnp.float32, -bound, bound)
        return w, b

    k1, k2, k3 = jax.random.split(key, 3)
    w1, b1 = linear(k1, state_dim, H1)
    w2, b2 = linear(k2, H1, H2)
    wv, bv = linear(k3, H2, 1)
    return (w1, b1, w2, b2, wv, bv)


def critic_reference(x, params, compute_dtype=jnp.float32):
    """Pure-JAX reference. compute_dtype=bf16 mirrors the kernel's MXU casts."""
    w1, b1, w2, b2, wv, bv = params
    cd = compute_dtype
    h1 = jnp.dot(x.astype(cd), w1.T.astype(cd),
                 preferred_element_type=jnp.float32) + b1
    h1 = _leaky_relu(h1)
    h2 = jnp.dot(h1.astype(cd), w2.T.astype(cd),
                 preferred_element_type=jnp.float32) + b2
    h2 = _leaky_relu(h2)
    v = jnp.dot(h2.astype(cd), wv.T.astype(cd),
                preferred_element_type=jnp.float32) + bv
    return v  # [B, 1]


if __name__ == "__main__":
    key = jax.random.PRNGKey(0)
    k_params, k_x = jax.random.split(key)

    batch, state_dim = 8, 32
    params = init_critic_params(k_params, state_dim)
    x = jax.random.normal(k_x, (batch, state_dim), jnp.float32)

    fwd = jax.jit(lambda xx: critic_forward(xx, params))
    out = jax.block_until_ready(fwd(x))
    assert out.shape == (batch, 1), out.shape

    # Tight check against a reference that uses the same bf16 operand casts.
    ref_bf16 = critic_reference(x, params, jnp.bfloat16)
    assert jnp.allclose(out, ref_bf16, atol=2e-4, rtol=2e-4), (out, ref_bf16)

    # Loose check against the full-f32 PyTorch-equivalent math
    # (tolerance relaxed because the kernel uses bf16 MXU operands).
    ref_f32 = critic_reference(x, params, jnp.float32)
    assert jnp.allclose(out, ref_f32, atol=3e-2, rtol=3e-2), (out, ref_f32)

    print("KERNEL_OK")
</pallas_src>

<mosaic_0001>
module attributes {stable_mosaic.version = 11 : i64} {
  func.func @critic_kernel(%arg0: i32, %arg1: memref<8x32xbf16, #tpu.memory_space<vmem>>, %arg2: memref<32x64xbf16, #tpu.memory_space<vmem>>, %arg3: memref<1x64xf32, #tpu.memory_space<vmem>>, %arg4: memref<64x32xbf16, #tpu.memory_space<vmem>>, %arg5: memref<1x32xf32, #tpu.memory_space<vmem>>, %arg6: memref<32x1xbf16, #tpu.memory_space<vmem>>, %arg7: memref<1xf32, #tpu.memory_space<smem>>, %arg8: memref<8x1xf32, #tpu.memory_space<vmem>>) attributes {dimension_semantics = [#tpu.dimension_semantics<parallel>], iteration_bounds = array<i64: 1>, scalar_prefetch = 0 : i64, scratch_operands = 0 : i64, tpu.core_type = #tpu.core_type<tc>, window_params = [{transform_indices = @transform_0, window_bounds = array<i64: 8, 32>}, {pipeline_mode = #tpu.pipeline_mode<synchronous>, transform_indices = @transform_1, window_bounds = array<i64: 32, 64>}, {pipeline_mode = #tpu.pipeline_mode<synchronous>, transform_indices = @transform_2, window_bounds = array<i64: 1, 64>}, {pipeline_mode = #tpu.pipeline_mode<synchronous>, transform_indices = @transform_3, window_bounds = array<i64: 64, 32>}, {pipeline_mode = #tpu.pipeline_mode<synchronous>, transform_indices = @transform_4, window_bounds = array<i64: 1, 32>}, {pipeline_mode = #tpu.pipeline_mode<synchronous>, transform_indices = @transform_5, window_bounds = array<i64: 32, 1>}, {transform_indices = @transform_6, window_bounds = array<i64: 1>}, {transform_indices = @transform_7, window_bounds = array<i64: 8, 1>}]} {
    %c0 = arith.constant 0 : index
    %c0_0 = arith.constant 0 : index
    %0 = vector.load %arg1[%c0, %c0_0] : memref<8x32xbf16, #tpu.memory_space<vmem>>, vector<8x32xbf16>
    %c0_1 = arith.constant 0 : index
    %c0_2 = arith.constant 0 : index
    %1 = vector.load %arg2[%c0_1, %c0_2] : memref<32x64xbf16, #tpu.memory_space<vmem>>, vector<32x64xbf16>
    %cst = arith.constant dense<0.000000e+00> : vector<8x64xf32>
    %2 = tpu.matmul %0, %1, %cst {dimension_numbers = #tpu.dot_dimension_numbers<[1], [0], [0], [1], [0, 0, 1, 1], [], []>} : vector<8x32xbf16>, vector<32x64xbf16>, vector<8x64xf32> -> vector<8x64xf32>
    %c0_3 = arith.constant 0 : index
    %c0_4 = arith.constant 0 : index
    %3 = vector.load %arg3[%c0_3, %c0_4] : memref<1x64xf32, #tpu.memory_space<vmem>>, vector<1x64xf32>
    %4 = vector.broadcast %3 : vector<1x64xf32> to vector<8x64xf32>
    %5 = arith.addf %2, %4 : vector<8x64xf32>
    %cst_5 = arith.constant 0.000000e+00 : f32
    %6 = vector.broadcast %cst_5 : f32 to vector<8x64xf32>
    %7 = arith.cmpf ogt, %5, %6 : vector<8x64xf32>
    %cst_6 = arith.constant 0.00999999977 : f32
    %8 = vector.broadcast %cst_6 : f32 to vector<8x64xf32>
    %9 = arith.mulf %8, %5 : vector<8x64xf32>
    %10 = arith.select %7, %5, %9 : vector<8x64xi1>, vector<8x64xf32>
    %11 = arith.truncf %10 : vector<8x64xf32> to vector<8x64xbf16>
    %c0_7 = arith.constant 0 : index
    %c0_8 = arith.constant 0 : index
    %12 = vector.load %arg4[%c0_7, %c0_8] : memref<64x32xbf16, #tpu.memory_space<vmem>>, vector<64x32xbf16>
    %cst_9 = arith.constant dense<0.000000e+00> : vector<8x32xf32>
    %13 = tpu.matmul %11, %12, %cst_9 {dimension_numbers = #tpu.dot_dimension_numbers<[1], [0], [0], [1], [0, 0, 1, 1], [], []>} : vector<8x64xbf16>, vector<64x32xbf16>, vector<8x32xf32> -> vector<8x32xf32>
    %c0_10 = arith.constant 0 : index
    %c0_11 = arith.constant 0 : index
    %14 = vector.load %arg5[%c0_10, %c0_11] : memref<1x32xf32, #tpu.memory_space<vmem>>, vector<1x32xf32>
    %15 = vector.broadcast %14 : vector<1x32xf32> to vector<8x32xf32>
    %16 = arith.addf %13, %15 : vector<8x32xf32>
    %cst_12 = arith.constant 0.000000e+00 : f32
    %17 = vector.broadcast %cst_12 : f32 to vector<8x32xf32>
    %18 = arith.cmpf ogt, %16, %17 : vector<8x32xf32>
    %cst_13 = arith.constant 0.00999999977 : f32
    %19 = vector.broadcast %cst_13 : f32 to vector<8x32xf32>
    %20 = arith.mulf %19, %16 : vector<8x32xf32>
    %21 = arith.select %18, %16, %20 : vector<8x32xi1>, vector<8x32xf32>
    %22 = arith.truncf %21 : vector<8x32xf32> to vector<8x32xbf16>
    %c0_14 = arith.constant 0 : index
    %c0_15 = arith.constant 0 : index
    %23 = vector.load %arg6[%c0_14, %c0_15] : memref<32x1xbf16, #tpu.memory_space<vmem>>, vector<32x1xbf16>
    %cst_16 = arith.constant dense<0.000000e+00> : vector<8x1xf32>
    %24 = tpu.matmul %22, %23, %cst_16 {dimension_numbers = #tpu.dot_dimension_numbers<[1], [0], [0], [1], [0, 0, 1, 1], [], []>} : vector<8x32xbf16>, vector<32x1xbf16>, vector<8x1xf32> -> vector<8x1xf32>
    %c0_17 = arith.constant 0 : index
    %25 = memref.load %arg7[%c0_17] : memref<1xf32, #tpu.memory_space<smem>>
    %26 = vector.broadcast %25 : f32 to vector<8x1xf32>
    %27 = arith.addf %24, %26 : vector<8x1xf32>
    %c0_18 = arith.constant 0 : index
    %c0_19 = arith.constant 0 : index
    %28 = vector.load %arg8[%c0_18, %c0_19] : memref<8x1xf32, #tpu.memory_space<vmem>>, vector<8x1xf32>
    tpu.vector_store %arg8[%c0_18, %c0_19], %27 {strides = array<i32>} : memref<8x1xf32, #tpu.memory_space<vmem>>, vector<8x1xf32>,
    return
  }
  func.func @transform_0(%arg0: i32) -> (i32, i32) {
    %c0_i32 = arith.constant 0 : i32
    %c0_i32_0 = arith.constant 0 : i32
    return %arg0, %c0_i32 : i32, i32
  }
  func.func @transform_1(%arg0: i32) -> (i32, i32) {
    %c0_i32 = arith.constant 0 : i32
    %c0_i32_0 = arith.constant 0 : i32
    %c0_i32_1 = arith.constant 0 : i32
    return %c0_i32, %c0_i32_0 : i32, i32
  }
  func.func @transform_2(%arg0: i32) -> (i32, i32) {
    %c0_i32 = arith.constant 0 : i32
    %c0_i32_0 = arith.constant 0 : i32
    %c0_i32_1 = arith.constant 0 : i32
    return %c0_i32, %c0_i32_0 : i32, i32
  }
  func.func @transform_3(%arg0: i32) -> (i32, i32) {
    %c0_i32 = arith.constant 0 : i32
    %c0_i32_0 = arith.constant 0 : i32
    %c0_i32_1 = arith.constant 0 : i32
    return %c0_i32, %c0_i32_0 : i32, i32
  }
  func.func @transform_4(%arg0: i32) -> (i32, i32) {
    %c0_i32 = arith.constant 0 : i32
    %c0_i32_0 = arith.constant 0 : i32
    %c0_i32_1 = arith.constant 0 : i32
    return %c0_i32, %c0_i32_0 : i32, i32
  }
  func.func @transform_5(%arg0: i32) -> (i32, i32) {
    %c0_i32 = arith.constant 0 : i32
    %c0_i32_0 = arith.constant 0 : i32
    %c0_i32_1 = arith.constant 0 : i32
    return %c0_i32, %c0_i32_0 : i32, i32
  }
  func.func @transform_6(%arg0: i32) -> i32 {
    %c0_i32 = arith.constant 0 : i32
    %c0_i32_0 = arith.constant 0 : i32
    return %c0_i32 : i32
  }
  func.func @transform_7(%arg0: i32) -> (i32, i32) {
    %c0_i32 = arith.constant 0 : i32
    %c0_i32_0 = arith.constant 0 : i32
    return %arg0, %c0_i32 : i32, i32
  }
}

</mosaic_0001>

<bundles_post_ra>
// kernel: _lambda_.1
= control target key start
LH: loop header
LB: loop body
LE: loop exit
PB: predicated region body
PF: predicated region fallthrough
CT: control target
= control target key end

     0   :  { %13 = vsyncpa [#allocation4], 0  ;;  %s457_s0 = inlined_call_operand.vmem [shape: bf16[8,32], index: 0, kind: input, shape index: {}]   ;;  %s458_s1 = inlined_call_operand.vmem [shape: bf16[32,64], index: 1, kind: input, shape index: {}]   ;;  %s459_s2 = inlined_call_operand.hbm [shape: f32[1,64], index: 2, kind: input, shape index: {}]   ;;  %s460_s3 = inlined_call_operand.hbm [shape: bf16[64,32], index: 3, kind: input, shape index: {}]   ;;  %s461_s4 = inlined_call_operand.hbm [shape: f32[1,32], index: 4, kind: input, shape index: {}]   ;;  %s462_s5 = inlined_call_operand.hbm [shape: bf16[32,1], index: 5, kind: input, shape index: {}]   ;;  %s463_s6 = inlined_call_operand.<no memory space> [shape: f32[1], index: 6, kind: input, shape index: {}]   ;;  %s464_s7 = inlined_call_operand.vmem [shape: f32[8,1], index: 7, kind: output, shape index: {}]  }
   0x1   :  { %14 = vsyncpa [#allocation6], 0  ;;  %s35_s26 = sshll.u32 %s460_s3, 4  ;;  %s36_s26 = int_to_ptr.hbm [resolvable:$true] %s35_s26 }
   0x2   :  { %15 = vsyncpa [#allocation9], 0  ;;  %s382_s27 = smov [#allocation5]   ;;  %s25_s8 = sshll.u32 %s459_s2, 4  ;;  %s26_s8 = int_to_ptr.hbm [resolvable:$true] %s25_s8 }
   0x3   :  { %s37_s28 = sshll.u32 %s382_s27, 4  ;;  %s383_s9 = smov 64   ;;  %s38_s28 = int_to_ptr.vmem [resolvable:$true] %s37_s28 }
   0x4   :  { %s384_s10 = smov 4   ;;  %s385_s11 = smov [#allocation3]  }
   0x5   :  { %43 = dma.hbm_to_vmem [thread:$0]  %s36_s26, 512, %s38_s28, [#allocation6], %s383_s9, %s383_s9, %s384_s10  }
   0x6   :  { %s27_s12 = sshll.u32 %s385_s11, 4  ;;  %s49_s15 = sshll.u32 %s461_s4, 4  ;;  %s28_s12 = int_to_ptr.vmem [resolvable:$true] %s27_s12  ;;  %s50_s15 = int_to_ptr.hbm [resolvable:$true] %s49_s15 }
   0x7   :  { %30 = dma.hbm_to_vmem [thread:$0]  %s26_s8, 16, %s28_s12, [#allocation4]  }
   0x8   :  { %s59_s17 = sshll.u32 %s462_s5, 4  ;;  %s386_s18 = smov [#allocation7]   ;;  %s60_s17 = int_to_ptr.hbm [resolvable:$true] %s59_s17 }
   0x9   :  { %s51_s19 = sshll.u32 %s386_s18, 4  ;;  %s387_s2 = smov [#allocation8]   ;;  %s52_s19 = int_to_ptr.vmem [resolvable:$true] %s51_s19 }
   0xa   :  { %54 = dma.hbm_to_vmem [thread:$0]  %s50_s15, 16, %s52_s19, [#allocation6]  }
   0xb   :  { %s61_s20 = sshll.u32 %s387_s2, 4  ;;  %s62_s20 = int_to_ptr.vmem [resolvable:$true] %s61_s20 }
   0xc   :  { %67 = dma.hbm_to_vmem [thread:$0]  %s60_s17, 256, %s62_s20, [#allocation9], %s383_s9, %s383_s9, %s384_s10  }
   0xd   :  { %376 = dma.done.wait [#allocation4], 16  }
   0xe   :  { %377 = vsyncadd [#allocation4], 4294967280 }
   0xf   :  { %378 = dma.done.wait [#allocation6], 528  }
  0x10   :  { %379 = vsyncadd [#allocation6], 4294966768 }
  0x11   :  { %380 = dma.done.wait [#allocation9], 256  }
  0x12   :  { %381 = vsyncadd [#allocation9], 4294967040  ;;  %v265_v0 = vld [vmem:[%s458_s1 + $0x8] sm:$0xff]  ;;  %v269_v1 = vld [vmem:[#allocation5 + $0x18] sm:$0xff]  ;;  %vm108_vm0 = vcmask 261120   ;;  %vm165_vm2 = vcmask 523264   ;;  %v191_v23 = vstv %s463_s6 }
  0x13   :  { %118 = vmatpush.bf16.msra.mxu0 %v265_v0  ;;  %v264_v2 = vld [vmem:[%s458_s1] sm:$0xff]  ;;  %173 = vmatpush.bf16.msra.mxu1 %v269_v1  ;;  %v268_v3 = vld [vmem:[#allocation5 + $0x10] sm:$0xff]  ;;  %v267_v5 = vld [vmem:[#allocation5 + $0x8] sm:$0xff]  ;;  %vm220_vm4 = vcmask 7168  }
  0x14   :  { %v87_v4 = vld [vmem:[%s457_s0] sm:$0xf]  ;;  %v271_v14 = vld [vmem:[#allocation8 + $0x8] sm:$0xff]  ;;  %v270_v15 = vld [vmem:[#allocation8] sm:$0xff] }
  0x15   :  { %v266_v6 = vld [vmem:[#allocation5] sm:$0xff]  ;;  %v278_v7 = vld [vmem:[#allocation3] ss:$0 sm:$0xff]  ;;  %213 = vmatpush.bf16.msra.mxu2 %v271_v14 }
  0x16   :  { %v279_v16 = vld [vmem:[#allocation7] ss:$0 sm:$0xff] }
  0x17   :  { %119 = vmatpush.bf16.msra.mxu0 %v264_v2  ;;  %174 = vmatpush.bf16.msra.mxu1 %v268_v3 }
  0x19   :  { %214 = vmatpush.bf16.msra.mxu2 %v270_v15 }
  0x1a   :  { %237 = vmatmul.msk.bf16.vlgmr.msra.gmra.mxu0 %vm108_vm0, %v87_v4 }
  0x1b   :  { %175 = vmatpush.bf16.msra.mxu1 %v267_v5 }
  0x1f   :  { %176 = vmatpush.bf16.msra.mxu1 %v266_v6 }
  0x97   :  { %v121_v8 = vpop.f32.mrf.mxu0 }
  0x98   :  { %v122_v9 = vadd.f32 %v278_v7, %v121_v8 }
  0x9a   :  { %vm125_vm1 = vcmp.gt.f32.partialorder %v122_v9, 0.0  ;;  %v126_v10 = vmul.f32 0.01, %v122_v9 }
  0x9c   :  { %v127_v11 = vsel %vm125_vm1, %v122_v9, %v126_v10 }
  0x9d   :  { %v128_v12 = vpack.c.bf16 %v127_v11, %v127_v11 }
  0x9f   :  { %v123_v13 = vpop.f32.mrf.mxu0  ;;  %254 = vmatmul.msk.bf16.vlgmr.msra.gmra.mxu1 %vm165_vm2, %v128_v12 }
 0x11c   :  { %v178_v17 = vpop.f32.mrf.mxu1 }
 0x11d   :  { %v179_v18 = vadd.f32 %v279_v16, %v178_v17 }
 0x11f   :  { %vm182_vm3 = vcmp.gt.f32.partialorder %v179_v18, 0.0  ;;  %v183_v19 = vmul.f32 0.01, %v179_v18 }
 0x121   :  { %v184_v20 = vsel %vm182_vm3, %v179_v18, %v183_v19 }
 0x122   :  { %v185_v21 = vpack.c.bf16 %v184_v20, %v184_v20 }
 0x124   :  { %v180_v22 = vpop.f32.mrf.mxu1  ;;  %263 = vmatmul.msk.bf16.vlgmr.msra.gmra.mxu2 %vm108_vm0, %v185_v21 }
 0x1a7   :  { %v216_v24 = vpop.f32.mrf.mxu2 }
 0x1a8   :  { %v217_v25 = vadd.f32 %v216_v24, %v191_v23 }
 0x1aa   :  { %221 = vst.msk [vmem:[%s464_s7] sm:$0xff] %vm220_vm4, %v217_v25 }
 0x1af   :  { %v218_v26 = vpop.f32.mrf.mxu2 }
 0x1b0   :  { %226 = vsyncpa [#allocation4], 1 }
 0x1b1   :  { %227 = vsyncpa [#allocation6], 1 }
 0x1b2   :  { %228 = vsyncpa [#allocation9], 1 }

</bundles_post_ra>
